<compile_context>
chip_gen: v7x
topology: tpu7x:2x2x1
jax: 0.10.0
libtpu: 0.0.40
codegen_flags: <defaults>
</compile_context>

<pallas_src>
import jax
import jax.numpy as jnp
import numpy as np
from jax.experimental import pallas as pl
from jax.experimental.pallas import tpu as pltpu


def mlp_encoding_kernel(e_ref, w1e_ref, b1t_ref, w2b_ref, b2t_ref, o_ref):
    # e_ref  : (TMR, FOLD)          -- FOLD scalar inputs folded per row
    # w1e_ref: (FOLD, FOLD*H)       -- block-diag expansion of w1 (1, H)
    # b1t_ref: (1, FOLD*H)          -- b1 tiled FOLD times
    # w2b_ref: (FOLD*H, FOLD*D)     -- block-diag expansion of w2 (H, D)
    # b2t_ref: (1, FOLD*D)          -- b2 tiled FOLD times
    # o_ref  : (TMR, FOLD*D)        -- lane-dense output (row-major == (TMR*FOLD, D))
    # Linear(1 -> H) for all FOLD folded scalars at once (block-diag weights).
    h = jnp.dot(e_ref[...], w1e_ref[...], preferred_element_type=jnp.float32)
    h = jnp.maximum(h + b1t_ref[...], 0.0)          # ReLU
    # dropout=0.0 -> identity (TODO(synk): training-mode dropout not implemented)
    # Linear(H -> D), block-diagonal so each fold stays independent.
    o = jnp.dot(h, w2b_ref[...], preferred_element_type=jnp.float32) + b2t_ref[...]
    o_ref[...] = o.astype(o_ref.dtype)


def _round_up(x, m):
    return ((x + m - 1) // m) * m


def _choose_fold(dim):
    """Fold factor so that fold*dim is lane-dense (128) when possible."""
    if dim < 128 and 128 % dim == 0:
        return 128 // dim
    return 1


def _expand_params(w1, b1, w2, b2, fold):
    """Build block-diagonal / tiled parameters for the lane-folded kernel."""
    eye = jnp.eye(fold, dtype=w1.dtype)
    w1e = jnp.kron(eye, w1)             # (fold, fold*H)
    w2b = jnp.kron(eye, w2)             # (fold*H, fold*D)
    b1t = jnp.tile(b1, (1, fold))       # (1, fold*H)
    b2t = jnp.tile(b2, (1, fold))       # (1, fold*D)
    return w1e, b1t, w2b, b2t


def mlp_encoding(e, w1, b1, w2, b2, *, tm=4096, out_dtype=None):
    """Apply MLPEncoding: returns array of shape (*e.shape, dim).

    tm        : row tile (number of scalar inputs per grid step). Sweep 1024-8192.
    out_dtype : output dtype (default: e.dtype). bf16 halves output HBM traffic
                if the model tolerates it.
    """
    orig_shape = e.shape
    dim = w2.shape[1]
    out_dtype = e.dtype if out_dtype is None else out_dtype

    fold = _choose_fold(dim)
    n = int(np.prod(orig_shape)) if orig_shape else 1

    # Shrink the tile for tiny inputs; keep the sublane dim (tm // fold) a
    # multiple of 8 so the BlockSpecs satisfy the (8, 128) tiling rule.
    row_quant = fold * 8
    tm = max(row_quant, min(tm, _round_up(n, row_quant)))
    tm = _round_up(tm, row_quant)
    n_pad = _round_up(n, tm)

    e_flat = e.reshape(-1)
    if n_pad != n:
        # Only the ragged tail block needs padding (at most tm-1 scalars).
        e_flat = jnp.pad(e_flat, (0, n_pad - n))
    e_fold = e_flat.reshape(n_pad // fold, fold)

    w1e, b1t, w2b, b2t = _expand_params(w1, b1, w2, b2, fold)

    rows = n_pad // fold
    tmr = tm // fold
    lane_out = fold * dim

    # Whole-array VMEM residency for the tiny expanded params (no per-step DMA).
    full_vmem = pl.BlockSpec(memory_space=pltpu.MemorySpace.VMEM)

    out = pl.pallas_call(
        mlp_encoding_kernel,
        out_shape=jax.ShapeDtypeStruct((rows, lane_out), out_dtype),
        grid_spec=pltpu.PrefetchScalarGridSpec(
            num_scalar_prefetch=0,
            grid=(rows // tmr,),
            in_specs=[
                pl.BlockSpec((tmr, fold), lambda i: (i, 0)),   # folded e rows
                full_vmem,                                     # w1 (block-diag), resident
                full_vmem,                                     # b1 (tiled), resident
                full_vmem,                                     # w2 (block-diag), resident
                full_vmem,                                     # b2 (tiled), resident
            ],
            out_specs=pl.BlockSpec((tmr, lane_out), lambda i: (i, 0)),
        ),
        compiler_params=pltpu.CompilerParams(
            dimension_semantics=("parallel",)),
    )(e_fold, w1e, b1t, w2b, b2t)

    # (rows, fold*dim) row-major is byte-identical to (n_pad, dim): free reshape.
    out = out.reshape(n_pad, dim)[:n]
    return out.reshape(*orig_shape, dim)


def init_params(key, dim):
    """Deterministic parameter init mimicking torch.nn.Linear defaults
    (uniform(-1/sqrt(fan_in), 1/sqrt(fan_in)))."""
    hidden = 2 * dim
    k1, k2, k3, k4 = jax.random.split(key, 4)
    bound1 = 1.0 / np.sqrt(1.0)       # fan_in = 1
    bound2 = 1.0 / np.sqrt(hidden)    # fan_in = hidden
    w1 = jax.random.uniform(k1, (1, hidden), jnp.float32, -bound1, bound1)
    b1 = jax.random.uniform(k2, (1, hidden), jnp.float32, -bound1, bound1)
    w2 = jax.random.uniform(k3, (hidden, dim), jnp.float32, -bound2, bound2)
    b2 = jax.random.uniform(k4, (1, dim), jnp.float32, -bound2, bound2)
    return w1, b1, w2, b2


def mlp_encoding_ref(e, w1, b1, w2, b2):
    """Pure-JAX reference (mirrors the PyTorch forward)."""
    pe = e[..., None]                              # unsqueeze(-1)
    h = jnp.maximum(pe @ w1 + b1[0], 0.0)          # Linear(1, 2*dim) + ReLU
    return h @ w2 + b2[0]                          # Linear(2*dim, dim)


if __name__ == "__main__":
    dim = 32
    key = jax.random.PRNGKey(0)
    kp, ke = jax.random.split(key)

    w1, b1, w2, b2 = init_params(kp, dim)

    # Example input: batch=2, seq=8 of scalar "edge" values
    e = jax.random.normal(ke, (2, 8), dtype=jnp.float32)

    out = mlp_encoding(e, w1, b1, w2, b2)
    out = jax.block_until_ready(out)

    ref = mlp_encoding_ref(e, w1, b1, w2, b2)
    assert out.shape == (2, 8, dim), out.shape
    np.testing.assert_allclose(np.asarray(out), np.asarray(ref),
                               rtol=1e-5, atol=1e-5)
    print("KERNEL_OK")
</pallas_src>

<mosaic_0001>
module attributes {stable_mosaic.version = 11 : i64} {
  func.func @mlp_encoding_kernel(%arg0: i32, %arg1: memref<8x4xf32, #tpu.memory_space<vmem>>, %arg2: memref<4x256xf32, #tpu.memory_space<vmem>>, %arg3: memref<1x256xf32, #tpu.memory_space<vmem>>, %arg4: memref<256x128xf32, #tpu.memory_space<vmem>>, %arg5: memref<1x128xf32, #tpu.memory_space<vmem>>, %arg6: memref<8x128xf32, #tpu.memory_space<vmem>>) attributes {dimension_semantics = [#tpu.dimension_semantics<parallel>], iteration_bounds = array<i64: 1>, scalar_prefetch = 0 : i64, scratch_operands = 0 : i64, tpu.core_type = #tpu.core_type<tc>, window_params = [{transform_indices = @transform_0, window_bounds = array<i64: 8, 4>}, {pipeline_mode = #tpu.pipeline_mode<synchronous>, transform_indices = @transform_1, window_bounds = array<i64: 4, 256>}, {pipeline_mode = #tpu.pipeline_mode<synchronous>, transform_indices = @transform_2, window_bounds = array<i64: 1, 256>}, {pipeline_mode = #tpu.pipeline_mode<synchronous>, transform_indices = @transform_3, window_bounds = array<i64: 256, 128>}, {pipeline_mode = #tpu.pipeline_mode<synchronous>, transform_indices = @transform_4, window_bounds = array<i64: 1, 128>}, {transform_indices = @transform_5, window_bounds = array<i64: 8, 128>}]} {
    %c0 = arith.constant 0 : index
    %c0_0 = arith.constant 0 : index
    %0 = vector.load %arg1[%c0, %c0_0] : memref<8x4xf32, #tpu.memory_space<vmem>>, vector<8x4xf32>
    %c0_1 = arith.constant 0 : index
    %c0_2 = arith.constant 0 : index
    %1 = vector.load %arg2[%c0_1, %c0_2] : memref<4x256xf32, #tpu.memory_space<vmem>>, vector<4x256xf32>
    %cst = arith.constant dense<0.000000e+00> : vector<8x256xf32>
    %2 = tpu.matmul %0, %1, %cst {dimension_numbers = #tpu.dot_dimension_numbers<[1], [0], [0], [1], [0, 0, 1, 1], [], []>} : vector<8x4xf32>, vector<4x256xf32>, vector<8x256xf32> -> vector<8x256xf32>
    %c0_3 = arith.constant 0 : index
    %c0_4 = arith.constant 0 : index
    %3 = vector.load %arg3[%c0_3, %c0_4] : memref<1x256xf32, #tpu.memory_space<vmem>>, vector<1x256xf32>
    %4 = vector.broadcast %3 : vector<1x256xf32> to vector<8x256xf32>
    %5 = arith.addf %2, %4 : vector<8x256xf32>
    %cst_5 = arith.constant 0.000000e+00 : f32
    %6 = vector.broadcast %cst_5 : f32 to vector<8x256xf32>
    %7 = arith.maximumf %5, %6 : vector<8x256xf32>
    %c0_6 = arith.constant 0 : index
    %c0_7 = arith.constant 0 : index
    %8 = vector.load %arg4[%c0_6, %c0_7] : memref<256x128xf32, #tpu.memory_space<vmem>>, vector<256x128xf32>
    %cst_8 = arith.constant dense<0.000000e+00> : vector<8x128xf32>
    %9 = tpu.matmul %7, %8, %cst_8 {dimension_numbers = #tpu.dot_dimension_numbers<[1], [0], [0], [1], [0, 0, 1, 1], [], []>} : vector<8x256xf32>, vector<256x128xf32>, vector<8x128xf32> -> vector<8x128xf32>
    %c0_9 = arith.constant 0 : index
    %c0_10 = arith.constant 0 : index
    %10 = vector.load %arg5[%c0_9, %c0_10] : memref<1x128xf32, #tpu.memory_space<vmem>>, vector<1x128xf32>
    %11 = vector.broadcast %10 : vector<1x128xf32> to vector<8x128xf32>
    %12 = arith.addf %9, %11 : vector<8x128xf32>
    %c0_11 = arith.constant 0 : index
    %c0_12 = arith.constant 0 : index
    %13 = vector.load %arg6[%c0_11, %c0_12] : memref<8x128xf32, #tpu.memory_space<vmem>>, vector<8x128xf32>
    tpu.vector_store %arg6[%c0_11, %c0_12], %12 {strides = array<i32>} : memref<8x128xf32, #tpu.memory_space<vmem>>, vector<8x128xf32>,
    return
  }
  func.func @transform_0(%arg0: i32) -> (i32, i32) {
    %c0_i32 = arith.constant 0 : i32
    %c0_i32_0 = arith.constant 0 : i32
    return %arg0, %c0_i32 : i32, i32
  }
  func.func @transform_1(%arg0: i32) -> (i32, i32) {
    %c0_i32 = arith.constant 0 : i32
    %c0_i32_0 = arith.constant 0 : i32
    %c0_i32_1 = arith.constant 0 : i32
    return %c0_i32, %c0_i32_0 : i32, i32
  }
  func.func @transform_2(%arg0: i32) -> (i32, i32) {
    %c0_i32 = arith.constant 0 : i32
    %c0_i32_0 = arith.constant 0 : i32
    %c0_i32_1 = arith.constant 0 : i32
    return %c0_i32, %c0_i32_0 : i32, i32
  }
  func.func @transform_3(%arg0: i32) -> (i32, i32) {
    %c0_i32 = arith.constant 0 : i32
    %c0_i32_0 = arith.constant 0 : i32
    %c0_i32_1 = arith.constant 0 : i32
    return %c0_i32, %c0_i32_0 : i32, i32
  }
  func.func @transform_4(%arg0: i32) -> (i32, i32) {
    %c0_i32 = arith.constant 0 : i32
    %c0_i32_0 = arith.constant 0 : i32
    %c0_i32_1 = arith.constant 0 : i32
    return %c0_i32, %c0_i32_0 : i32, i32
  }
  func.func @transform_5(%arg0: i32) -> (i32, i32) {
    %c0_i32 = arith.constant 0 : i32
    %c0_i32_0 = arith.constant 0 : i32
    return %arg0, %c0_i32 : i32, i32
  }
}

</mosaic_0001>

<bundles_post_ra>
// kernel: tpu_custom_call.1
= control target key start
LH: loop header
LB: loop body
LE: loop exit
PB: predicated region body
PF: predicated region fallthrough
CT: control target
= control target key end

     0   :  { %10 = vsyncpa [#allocation3], 0  ;;  %s456_s0 = inlined_call_operand.vmem [shape: f32[8,4], index: 0, kind: input, shape index: {}]   ;;  %s457_s1 = inlined_call_operand.vmem [shape: f32[4,256], index: 1, kind: input, shape index: {}]   ;;  %s458_s2 = inlined_call_operand.vmem [shape: f32[1,256], index: 2, kind: input, shape index: {}]   ;;  %s459_s3 = inlined_call_operand.hbm [shape: f32[256,128], index: 3, kind: input, shape index: {}]   ;;  %s460_s4 = inlined_call_operand.vmem [shape: f32[1,128], index: 4, kind: input, shape index: {}]   ;;  %s461_s5 = inlined_call_operand.hbm [shape: f32[8,128], index: 5, kind: output, shape index: {}]  }
   0x1   :  { %11 = vsyncpa [#allocation4], 0  ;;  %s383_s18 = smov [#allocation2]   ;;  %s335_s22 = scalar_lea.hbm %s459_s3, 4096 }
   0x2   :  { %s23_s19 = sshll.u32 %s383_s18, 4  ;;  %p336_p0 = scmp.ne.s32.totalorder %s459_s3, %s335_s22  ;;  %s24_s19 = int_to_ptr.vmem [resolvable:$true] %s23_s19 }
   0x3   :  { %p339_p1 = scmp.lt.u32.totalorder %s335_s22, %s459_s3 }
   0x5   :  { %p341_p2 = pnand %p339_p1, %p336_p0 }
   0x7   :  { %344 = shalt.err (!%p341_p2)
}
   0x8   :  { %s345_s27 = scalar_lea.vmem %s24_s19, 4096  ;;  %p350_p4 = scmp.lt.s32.totalorder %s24_s19, %s24_s19 }
   0x9   :  { %p346_p3 = scmp.ne.s32.totalorder %s24_s19, %s345_s27  ;;  %p351_p5 = scmp.lt.s32.totalorder %s345_s27, %s345_s27 }
   0xb   :  { %p352_p6 = por %p351_p5, %p350_p4 }
   0xd   :  { %p353_p7 = pnand %p352_p6, %p346_p3 }
   0xf   :  { %356 = shalt.err (!%p353_p7)
}
  0x10   :  { %s384_s28 = smov 128   ;;  %s385_s29 = smov 8  }
  0x11   :  { %29 = dma.hbm_to_vmem [thread:$0]  %s459_s3, 4096, %s24_s19, [#allocation3], %s384_s28, %s384_s28, %s385_s29  }
  0x12   :  { %379 = dma.done.wait [#allocation3], 4096  }
  0x13   :  { %380 = vsyncadd [#allocation3], 4294963200  ;;  %v386_v0 = vmov 0.0   ;;  %v36_v1 = vld [vmem:[%s457_s1] sm:$0xff]  ;;  %vm55_vm0 = vcmask 1043456   ;;  %v149_v3 = vld [vmem:[#allocation2 + $0x80] sm:$0xff]  ;;  %v39_v52 = vlaneseq }
  0x14   :  { %124 = vmatprep.mubr.f32.mxu0 %v386_v0  ;;  %v35_v2 = vld [vmem:[%s456_s0] sm:$0xff]  ;;  %v50_v4 = vcombine.high %v36_v1, %v36_v1  ;;  %v150_v5 = vld [vmem:[#allocation2 + $0x88] sm:$0xff]  ;;  %v133_v6 = vld [vmem:[#allocation2] sm:$0xff]  ;;  %vm51_vm1 = vcmask 31744   ;;  %s387_s12 = smov [#allocation5]  }
  0x15   :  { %v134_v7 = vld [vmem:[#allocation2 + $0x8] sm:$0xff]  ;;  %v297_v8 = vpack.c.bf16 %v150_v5, %v149_v3  ;;  %v151_v10 = vld [vmem:[#allocation2 + $0x90] sm:$0xff]  ;;  %v152_v11 = vld [vmem:[#allocation2 + $0x98] sm:$0xff]  ;;  %v40_v53 = vshrl.u32 %v39_v52, 7  ;;  %s249_s13 = sshll.u32 %s387_s12, 4  ;;  %s250_s13 = int_to_ptr.vmem [resolvable:$true] %s249_s13 }
  0x16   :  { %v299_v9 = vpack.c.bf16 %v134_v7, %v133_v6  ;;  %v135_v12 = vld [vmem:[#allocation2 + $0x10] sm:$0xff]  ;;  %258 = vmatprep.subr.msk.mxu0 %vm55_vm0, %v50_v4  ;;  %v301_v13 = vpack.c.bf16 %v152_v11, %v151_v10  ;;  %v136_v14 = vld [vmem:[#allocation2 + $0x18] sm:$0xff]  ;;  %v153_v15 = vld [vmem:[#allocation2 + $0xa0] sm:$0xff]  ;;  %p362_p9 = scmp.lt.s32.totalorder %s250_s13, %s250_s13 }
  0x17   :  { %v154_v16 = vld [vmem:[#allocation2 + $0xa8] sm:$0xff]  ;;  %259 = vmatpush1.msk.msra.mxu0 %vm55_vm0, %v36_v1  ;;  %298 = vmatprep.subr.bf16.mxu1 %v297_v8  ;;  %v303_v17 = vpack.c.bf16 %v136_v14, %v135_v12  ;;  %v137_v19 = vld [vmem:[#allocation2 + $0x20] sm:$0xff]  ;;  %v155_v21 = vld [vmem:[#allocation2 + $0xb0] sm:$0xff]  ;;  %v41_v54 = vsub.s32 0, %v40_v53  ;;  %v45_v56 = vsub.s32 1, %v40_v53 }
  0x18   :  { %260 = vmatmul.mubr.msk.f32.vlgmr.msra.gmra.mrb[0].mxu0 %vm51_vm1, %v35_v2  ;;  %300 = vmatpush3.bf16.msra.mxu1 %v299_v9  ;;  %v305_v18 = vpack.c.bf16 %v154_v16, %v153_v15  ;;  %v138_v20 = vld [vmem:[#allocation2 + $0x28] sm:$0xff]  ;;  %v156_v22 = vld [vmem:[#allocation2 + $0xb8] sm:$0xff]  ;;  %v139_v25 = vld [vmem:[#allocation2 + $0x30] sm:$0xff] }
  0x19   :  { %302 = vmatprep.subr.bf16.mxu1 %v301_v13  ;;  %v307_v23 = vpack.c.bf16 %v138_v20, %v137_v19  ;;  %v309_v24 = vpack.c.bf16 %v156_v22, %v155_v21  ;;  %v140_v26 = vld [vmem:[#allocation2 + $0x38] sm:$0xff]  ;;  %v157_v27 = vld [vmem:[#allocation2 + $0xc0] sm:$0xff]  ;;  %v158_v28 = vld [vmem:[#allocation2 + $0xc8] sm:$0xff] }
  0x1a   :  { %v311_v29 = vpack.c.bf16 %v140_v26, %v139_v25  ;;  %v313_v30 = vpack.c.bf16 %v158_v28, %v157_v27  ;;  %v141_v31 = vld [vmem:[#allocation2 + $0x40] sm:$0xff]  ;;  %v142_v32 = vld [vmem:[#allocation2 + $0x48] sm:$0xff]  ;;  %v159_v33 = vld [vmem:[#allocation2 + $0xd0] sm:$0xff] }
  0x1b   :  { %v160_v34 = vld [vmem:[#allocation2 + $0xd8] sm:$0xff]  ;;  %v315_v35 = vpack.c.bf16 %v142_v32, %v141_v31  ;;  %v143_v37 = vld [vmem:[#allocation2 + $0x50] sm:$0xff]  ;;  %v161_v39 = vld [vmem:[#allocation2 + $0xe0] sm:$0xff] }
  0x1c   :  { %304 = vmatpush3.bf16.msra.mxu1 %v303_v17  ;;  %v317_v36 = vpack.c.bf16 %v160_v34, %v159_v33  ;;  %v144_v38 = vld [vmem:[#allocation2 + $0x58] sm:$0xff]  ;;  %v162_v40 = vld [vmem:[#allocation2 + $0xe8] sm:$0xff]  ;;  %v145_v43 = vld [vmem:[#allocation2 + $0x60] sm:$0xff] }
  0x1d   :  { %306 = vmatprep.subr.bf16.mxu1 %v305_v18  ;;  %v319_v41 = vpack.c.bf16 %v144_v38, %v143_v37  ;;  %v321_v42 = vpack.c.bf16 %v162_v40, %v161_v39  ;;  %v146_v44 = vld [vmem:[#allocation2 + $0x68] sm:$0xff]  ;;  %v163_v46 = vld [vmem:[#allocation2 + $0xf0] sm:$0xff]  ;;  %v164_v47 = vld [vmem:[#allocation2 + $0xf8] sm:$0xff] }
  0x1e   :  { %v323_v45 = vpack.c.bf16 %v146_v44, %v145_v43  ;;  %v325_v48 = vpack.c.bf16 %v164_v47, %v163_v46  ;;  %v147_v49 = vld [vmem:[#allocation2 + $0x70] sm:$0xff]  ;;  %v148_v50 = vld [vmem:[#allocation2 + $0x78] sm:$0xff] }
  0x1f   :  { %v327_v51 = vpack.c.bf16 %v148_v50, %v147_v49  ;;  %v37_v55 = vld [vmem:[%s458_s2] sm:$0x3]  ;;  %s357_s2 = scalar_lea.vmem %s250_s13, 128 }
  0x20   :  { %308 = vmatpush3.bf16.msra.mxu1 %v307_v23  ;;  %v42_v57 = vrot.slane %v37_v55, %v41_v54  ;;  %v46_v58 = vrot.slane %v37_v55, %v45_v56  ;;  %v261_v2 = vld [vmem:[%s460_s4] ss:$0 sm:$0xff]  ;;  %p358_p8 = scmp.ne.s32.totalorder %s250_s13, %s357_s2  ;;  %p363_p10 = scmp.lt.s32.totalorder %s357_s2, %s357_s2 }
  0x21   :  { %310 = vmatprep.subr.bf16.mxu1 %v309_v24 }
  0x22   :  { %p364_p11 = por %p363_p10, %p362_p9 }
  0x24   :  { %312 = vmatpush3.bf16.msra.mxu1 %v311_v29  ;;  %p365_p12 = pnand %p364_p11, %p358_p8 }
  0x25   :  { %314 = vmatprep.subr.bf16.mxu1 %v313_v30 }
  0x28   :  { %316 = vmatpush3.bf16.msra.mxu1 %v315_v35 }
  0x29   :  { %318 = vmatprep.subr.bf16.mxu1 %v317_v36 }
  0x2c   :  { %320 = vmatpush3.bf16.msra.mxu1 %v319_v41 }
  0x2d   :  { %322 = vmatprep.subr.bf16.mxu1 %v321_v42 }
  0x30   :  { %324 = vmatpush3.bf16.msra.mxu1 %v323_v45 }
  0x31   :  { %326 = vmatprep.subr.bf16.mxu1 %v325_v48 }
  0x34   :  { %328 = vmatpush3.bf16.msra.mxu1 %v327_v51 }
  0xeb   :  { %v126_v59 = vpop.f32.mrb[0].mxu0 }
  0xec   :  { %v127_v60 = vadd.f32 %v126_v59, %v42_v57  ;;  %v128_v61 = vpop.f32.mrb[1].mxu0 }
  0xed   :  { %v129_v62 = vadd.f32 %v128_v61, %v46_v58 }
  0xee   :  { %v131_v0 = vmax.f32 %v127_v60, 0.0 }
  0xef   :  { %v132_v63 = vmax.f32 %v129_v62, 0.0 }
  0xf1   :  { %236 = vmatprep.mubr.f32.mxu1 %v132_v63 }
  0xf2   :  { %237 = vmatmul.mubr.f32.vlgmr.msra.gmra.mrb[0].mxu1 %v131_v0 }
 0x1c5   :  { %v294_v1 = vpop.f32.mrb[0].mxu1 }
 0x1c6   :  { %v295_v3 = vpop.f32.mrb[1].mxu1 }
 0x1c7   :  { %v296_v4 = vadd.f32 %v295_v3, %v294_v1 }
 0x1c9   :  { %v239_v5 = vadd.f32 %v296_v4, %v261_v2 }
 0x1cb   :  { %242 = vst [vmem:[#allocation5] sm:$0xff] %v239_v5 }
 0x1cc   :  { %368 = shalt.err (!%p365_p12)
}
 0x1cd   :  { %s369_s16 = scalar_lea.hbm %s461_s5, 128 }
 0x1ce   :  { %p370_p13 = scmp.ne.s32.totalorder %s461_s5, %s369_s16  ;;  %p373_p0 = scmp.lt.u32.totalorder %s369_s16, %s461_s5 }
 0x1d0   :  { %p375_p1 = pnand %p373_p0, %p370_p13 }
 0x1d2   :  { %378 = shalt.err (!%p375_p1)
}
 0x1d3   :  { %252 = dma.vmem_to_hbm [thread:$0]  %s250_s13, 128, %s461_s5, [#allocation4]  }
 0x1d4   :  { %381 = dma.done.wait [#allocation4], 128  }
 0x1d5   :  { %382 = vsyncadd [#allocation4], 4294967168 }
 0x1d6   :  { %256 = vsyncpa [#allocation3], 1 }
 0x1d7   :  { %257 = vsyncpa [#allocation4], 1 }

</bundles_post_ra>
